<compile_context>
chip_gen: v5e
topology: v5e:2x2
jax: 0.10.0
libtpu: 0.0.40
codegen_flags: <defaults>
</compile_context>

<pallas_src>
import functools
import math

import jax
import jax.numpy as jnp
import numpy as np
from jax.experimental import pallas as pl
from jax.experimental.pallas import tpu as pltpu

_LANE = 128


def _pair(x):
    return (x, x) if isinstance(x, int) else x


def make_factor(size, offset=None):
    """Precompute the -(dx^2 + dy^2)/2 grid, as in KernelGenerator.__init__."""
    s = _pair(size)[0]
    xx, yy = np.meshgrid(np.arange(0, s), np.arange(0, s))
    if offset is None:
        off_x = off_y = s // 2
    else:
        off_x, off_y = _pair(offset)
    factor = -(np.power(xx - off_x, 2) + np.power(yy - off_y, 2)) / 2.0
    return np.asarray(factor, dtype=np.float32)


def _kernel_body(theta_ref, factor_ref, out_ref, *, size, max_factor):
    # theta_ref : (B,) f32 scalar-prefetch ref (SMEM)
    # factor_ref: (R, 128) f32 in VMEM (resident across the grid)
    # out_ref   : (1, R, 128) f32 VMEM block for the current theta
    b = pl.program_id(0)
    theta = theta_ref[b]
    ts = theta * size
    inv_pow2 = 1.0 / (ts * ts)  # scalar reciprocal, off the vector critical path
    # kernel / kernel.max() == exp((factor - max(factor)) / pow2)  (exact: the
    # 1/(2*pi*pow2) scale cancels and exp is monotone), so no reduce, no divide.
    out_ref[0] = jnp.exp((factor_ref[...] - max_factor) * inv_pow2)


def kernel_generator(theta, factor, size):
    """Pallas-backed equivalent of KernelGenerator.forward(theta).

    theta : scalar or (B,) float32 array.
    factor: (S, S) constant grid from make_factor (numpy or jax array).
    Returns (S, S) for scalar theta, (B, S, S) for batched theta.
    """
    theta = jnp.asarray(theta, dtype=jnp.float32)
    scalar_in = theta.ndim == 0
    theta_b = jnp.atleast_1d(theta)
    B = theta_b.shape[0]

    factor_np = np.asarray(factor, dtype=np.float32)
    S = factor_np.shape[0]
    n = S * S
    R = max(1, -(-n // _LANE))          # cdiv(n, 128)
    n_pad = R * _LANE
    max_factor = float(np.max(factor_np))   # trace-time constant (0.0 if centered)

    flat = factor_np.reshape(-1)
    if n_pad != n:
        # pad with max_factor -> exp(0) = 1, padded lanes are discarded below
        flat = np.concatenate([flat, np.full((n_pad - n,), max_factor, np.float32)])
    factor_slab = jnp.asarray(flat.reshape(R, _LANE))

    out = pl.pallas_call(
        functools.partial(_kernel_body, size=float(size), max_factor=max_factor),
        out_shape=jax.ShapeDtypeStruct((B, R, _LANE), jnp.float32),
        grid_spec=pltpu.PrefetchScalarGridSpec(
            num_scalar_prefetch=1,                      # theta -> SMEM
            grid=(B,),
            in_specs=[
                # factor stays resident in VMEM across all thetas
                pl.BlockSpec((R, _LANE), lambda b, theta_ref: (0, 0)),
            ],
            out_specs=pl.BlockSpec((1, R, _LANE), lambda b, theta_ref: (b, 0, 0)),
        ),
        compiler_params=pltpu.CompilerParams(
            dimension_semantics=("parallel",),
        ),
        cost_estimate=pl.CostEstimate(
            flops=2 * B * n_pad,
            transcendentals=B * n_pad,
            bytes_accessed=(B + 1) * n_pad * 4 + B * 4,
        ),
    )(theta_b, factor_slab)

    out = out.reshape(B, n_pad)[:, :n].reshape(B, S, S)
    if scalar_in:
        out = out[0]
    return out


def kernel_generator_ref(theta, factor, size):
    """Pure-JAX reference mirroring the original PyTorch forward exactly."""
    pow2 = jnp.power(theta * size, 2)
    k = 1.0 / (2.0 * jnp.pi * pow2) * jnp.exp(factor / pow2)
    return k / jnp.max(k)


if __name__ == "__main__":
    SIZE = 16   # spatial kernel size -> (16, 16) output
    B = 4       # batch of theta values processed in one pallas_call

    key = jax.random.PRNGKey(0)
    # theta: positive scalar(s) (learned std-dev-like parameter)
    thetas = jax.random.uniform(key, (B,), dtype=jnp.float32, minval=0.5, maxval=1.5)

    factor_np = make_factor(SIZE)            # deterministic constant from __init__ math
    factor_j = jnp.asarray(factor_np)

    # batched path
    out = kernel_generator(thetas, factor_np, SIZE)
    out = jax.block_until_ready(out)
    ref = jax.vmap(lambda t: kernel_generator_ref(t, factor_j, float(SIZE)))(thetas)
    np.testing.assert_allclose(np.asarray(out), np.asarray(ref), rtol=1e-5, atol=1e-6)
    assert out.shape == (B, SIZE, SIZE) and out.dtype == jnp.float32

    # scalar-theta path (original module's forward(theta) semantics)
    out1 = jax.block_until_ready(kernel_generator(thetas[0], factor_np, SIZE))
    ref1 = kernel_generator_ref(thetas[0], factor_j, float(SIZE))
    np.testing.assert_allclose(np.asarray(out1), np.asarray(ref1), rtol=1e-5, atol=1e-6)
    assert out1.shape == (SIZE, SIZE) and out1.dtype == jnp.float32

    print("KERNEL_OK")
</pallas_src>

<mosaic_0001>
module attributes {stable_mosaic.version = 11 : i64} {
  func.func @_kernel_body(%arg0: i32, %arg1: memref<4xf32, #tpu.memory_space<smem>>, %arg2: memref<2x128xf32, #tpu.memory_space<vmem>>, %arg3: memref<1x2x128xf32, #tpu.memory_space<vmem>>) attributes {dimension_semantics = [#tpu.dimension_semantics<parallel>], iteration_bounds = array<i64: 4>, scalar_prefetch = 1 : i64, scratch_operands = 0 : i64, tpu.core_type = #tpu.core_type<tc>, window_params = [{pipeline_mode = #tpu.pipeline_mode<synchronous>, transform_indices = @transform_0, window_bounds = array<i64: 2, 128>}, {transform_indices = @transform_1, window_bounds = array<i64: 1, 2, 128>}]} {
    %0 = arith.index_cast %arg0 : i32 to index
    %1 = memref.load %arg1[%0] : memref<4xf32, #tpu.memory_space<smem>>
    %cst = arith.constant 1.600000e+01 : f32
    %2 = arith.mulf %1, %cst : f32
    %3 = arith.mulf %2, %2 : f32
    %cst_0 = arith.constant 1.000000e+00 : f32
    %4 = arith.divf %cst_0, %3 : f32
    %c0 = arith.constant 0 : index
    %c0_1 = arith.constant 0 : index
    %5 = vector.load %arg2[%c0, %c0_1] : memref<2x128xf32, #tpu.memory_space<vmem>>, vector<2x128xf32>
    %cst_2 = arith.constant 0.000000e+00 : f32
    %6 = vector.broadcast %cst_2 : f32 to vector<2x128xf32>
    %7 = arith.subf %5, %6 : vector<2x128xf32>
    %8 = vector.broadcast %4 : f32 to vector<2x128xf32>
    %9 = arith.mulf %7, %8 : vector<2x128xf32>
    %10 = math.exp %9 : vector<2x128xf32>
    %c0_3 = arith.constant 0 : index
    %c0_4 = arith.constant 0 : index
    %c0_5 = arith.constant 0 : index
    %11 = vector.load %arg3[%c0_3, %c0_4, %c0_5] : memref<1x2x128xf32, #tpu.memory_space<vmem>>, vector<1x2x128xf32>
    %12 = vector.shape_cast %11 : vector<1x2x128xf32> to vector<2x128xf32>
    %13 = vector.shape_cast %10 : vector<2x128xf32> to vector<1x2x128xf32>
    tpu.vector_store %arg3[%c0_3, %c0_4, %c0_5], %13 {strides = array<i32>} : memref<1x2x128xf32, #tpu.memory_space<vmem>>, vector<1x2x128xf32>,
    return
  }
  func.func @transform_0(%arg0: i32, %arg1: memref<4xf32, #tpu.memory_space<smem>>) -> (i32, i32) {
    %c0_i32 = arith.constant 0 : i32
    %c0_i32_0 = arith.constant 0 : i32
    %c0_i32_1 = arith.constant 0 : i32
    return %c0_i32, %c0_i32_0 : i32, i32
  }
  func.func @transform_1(%arg0: i32, %arg1: memref<4xf32, #tpu.memory_space<smem>>) -> (i32, i32, i32) {
    %c0_i32 = arith.constant 0 : i32
    %c0_i32_0 = arith.constant 0 : i32
    %c0_i32_1 = arith.constant 0 : i32
    return %arg0, %c0_i32, %c0_i32_0 : i32, i32, i32
  }
}

</mosaic_0001>

<bundles_post_ra>
// kernel: tpu_custom_call.1
= control target key start
LH: loop header
LB: loop body
LE: loop exit
PB: predicated region body
PF: predicated region fallthrough
CT: control target
= control target key end

     0   :  { %s398_s12 = smov [#allocation3]   ;;  %s503_s0 = inlined_call_operand.hbm [shape: f32[4], index: 0, kind: input, shape index: {}]   ;;  %s504_s1 = inlined_call_operand.hbm [shape: f32[2,128], index: 1, kind: input, shape index: {}]   ;;  %s505_s2 = inlined_call_operand.hbm [shape: f32[4,2,128], index: 2, kind: output, shape index: {}]  }
   0x1   :  { %s8_s11 = sshll.u32 %s503_s0, 4  ;;  %s9_s11 = int_to_ptr.hbm [resolvable:$true] %s8_s11 }
   0x2   :  { %11 = dma.hbm_to_smem %s9_s11, 16, %s398_s12, [#allocation2] }
   0x3   :  { %372 = dma.done.wait [#allocation2], 16 }
   0x4   :  { %373 = vsyncadd [#allocation2], 4294967280 }
   0x5   :  { %14 = sfence }
   0x6   :  { %15 = vsyncpa [#allocation5], 0 }
   0x7   :  { %16 = vsyncpa [#allocation6], 0 }
   0x8   :  { %18 = vsyncpa [#allocation6 + $0x1], 0  ;;  %s418_s13 = smov 0   ;;  %s420_s14 = smov 0  }
   0x9   :  { %s422_s15 = smov 0   ;;  %s424_s16 = smov 0  }
   0xa LB: > { %s439_s0 = sadd.s32 4294967295, %s396_s16   ;;  %s219_s17 = sadd.s32 4294967294, %s396_s16   ;;  %s396_s16 = sphi %s424_s16, %s511_s16   ;;  %s392_s15 = sphi %s422_s15, %s510_s15   ;;  %s388_s14 = sphi %s420_s14, %s509_s14   ;;  %s384_s13 = sphi %s418_s13, %s508_s13  }
   0xb   : > { %s443_s18 = sadd.s32 1, %s396_s16   ;;  %s52_s19 = sadd.s32 1, %s392_s15 }
   0xc   : > { %s49_s20 = ssub.s32 %s396_s16, %s443_s18  ;;  %p62_p0 = scmp.ne.s32.totalorder %s392_s15, %s388_s14 }
   0xd   : > { %p50_p1 = scmp.eq.s32.totalorder %s49_s20, 0  ;;  %p63_p2 = scmp.eq.s32.totalorder %s439_s0, 3 }
   0xe   : > { %p68_p3 = scmp.ne.s32.totalorder %s388_s14, %s384_s13  ;;  %p69_p4 = scmp.eq.s32.totalorder %s219_s17, 3 }
   0xf   : > { %s454_s21 = scalar_select %p50_p1, %s392_s15, %s52_s19  }
  0x10   : > { %p456_p5 = por %p63_p2, %p62_p0  ;;  %p460_p6 = por %p69_p4, %p68_p3 }
  0x11   : > { %p220_p7 = scmp.ge.s32.totalorder %s396_s16, 1  ;;  %p76_p8 = scmp.lt.s32.totalorder %s396_s16, 5 }
  0x12   : > { %p245_p9 = scmp.eq.s32.totalorder %s439_s0, 0  ;;  %s88_s26 = sshll.u32 %s504_s1, 4  ;;  %s89_s26 = int_to_ptr.hbm [resolvable:$true] %s88_s26 }
  0x13   : > { %p77_p10 = pnand %p220_p7, %p76_p8  ;;  %s399_s27 = smov [#allocation4]  }
  0x14   : > { %s90_s28 = sshll.u32 %s399_s27, 4  ;;  %s91_s28 = int_to_ptr.vmem [resolvable:$true] %s90_s28 }
  0x15   : > { %p237_p11 = pneg %p77_p10  ;;  %103 = sbr.rel (%p77_p10) target bundleno = 120 (0x78), region = 24 }
  0x17   : > { %p238_p12 = pnand %p245_p9, %p237_p11 }
  0x19   : > { %240 = dma.hbm_to_vmem [thread:$0]  (!%p238_p12), %s89_s26, 32, %s91_s28, [#allocation5]  }
  0x1a   : > { %375 = dma.done.wait (%p245_p9), [#allocation5], 32  }
  0x1b   : > { %377 = vsyncadd (%p245_p9), [#allocation5], 4294967264  ;;  %s119_s29 = sld [smem:[#allocation3 + %s439_s0]]  ;;  %v138_v11 = vld [vmem:[#allocation4] sm:$0x3]  ;;  %s116_s4 = sand.u32 1, %s388_s14  }
  0x1c   : > { %s224_s6 = sshll.u32 %s116_s4, 1  ;;  %s226_s7 = sshll.u32 %s439_s0, 1 }
  0x1d   : > { %s155_s10 = scalar_lea.hbm %s505_s2, %s226_s7  ;;  %s118_s11 = scalar_lea.vmem [#allocation7], %s224_s6 }
  0x1e   : > { %s157_s12 = sshll.u32 %s118_s11, 4  ;;  %s159_s17 = sshll.u32 %s155_s10, 4  ;;  %s158_s12 = int_to_ptr.vmem [resolvable:$true] %s157_s12  ;;  %s160_s17 = int_to_ptr.hbm [resolvable:$true] %s159_s17 }
  0x1f   : > { %s145_s19 = scalar_lea.sflag [#allocation6], %s116_s4  ;;  %s342_s20 = sshra.s32 %s160_s17, 4  ;;  %s343_s20 = int_to_ptr.hbm [resolvable:$true] %s342_s20 }
  0x20   : > { %s344_s24 = scalar_lea.hbm %s343_s20, 2  ;;  %s348_s26 = scalar_lea.hbm %s505_s2, 8 }
  0x21   : > { %s120_s30 = smul.f32 16.0, %s119_s29  ;;  %p345_p13 = scmp.ne.s32.totalorder %s343_s20, %s344_s24 }
  0x22   : > { %p349_p2 = scmp.lt.s32.totalorder %s343_s20, %s505_s2  ;;  %p350_p3 = scmp.lt.s32.totalorder %s348_s26, %s344_s24 }
  0x23   : > { %s121_s3 = smul.f32 %s120_s30, %s120_s30  ;;  %p346_p0 = pnand %p345_p13, %p456_p5 }
  0x24   : > { %p351_p4 = por %p350_p3, %p349_p2 }
  0x25   : > { %v122_v0 = vstv %s121_s3  ;;  %p347_p1 = pneg %p346_p0 }
  0x26   : > { %282 = vrcp.f32 %v122_v0  ;;  %v134_v3 = vand.u32 2147483648, %v122_v0  ;;  %vm128_vm0 = vweird.f32 %v122_v0  ;;  %v132_v5 = vand.u32 2147483647, %v122_v0 }
  0x27   : > { %p352_p7 = pnand %p351_p4, %p347_p1 }
  0x28   : > { %v135_v7 = vor.u32 1.1754944e-38, %v134_v3  ;;  %vm133_vm3 = vcmp.eq.f32.partialorder %v132_v5, 8.507059e+37 }
  0x2c   : > { %v283_v1 = vpop.eup %282 }
  0x2d   : > { %v124_v2 = vmul.f32 %v283_v1, %v122_v0  ;;  %vm129_vm1 = vweird.f32 %v283_v1 }
  0x2e   : > { %vm130_vm2 = vmor %vm128_vm0, %vm129_vm1 }
  0x2f   : > { %v125_v4 = vsub.f32 1.0, %v124_v2 }
  0x31   : > { %v126_v6 = vmul.f32 %v283_v1, %v125_v4 }
  0x33   : > { %v127_v8 = vadd.f32 %v283_v1, %v126_v6 }
  0x35   : > { %v131_v9 = vsel %vm130_vm2, %v283_v1, %v127_v8 }
  0x36   : > { %v136_v10 = vsel %vm133_vm3, %v135_v7, %v131_v9 }
  0x37   : > { %229 = vpush %v136_v10 }
  0x68   : > { %s230_s5 = spop %229 }
  0x69   : > { %v139_v12 = vstv %s230_s5 }
  0x6a   : > { %v140_v13 = vmul.f32 %v139_v12, %v138_v11 }
  0x6c   : > { %v141_v14 = vmul.f32 1.442695, %v140_v13 }
  0x6e   : > { %284 = vpow2.f32 %v141_v14 }
  0x74   : > { %v285_v15 = vpop.eup %284 }
  0x75   : > { %143 = vst [vmem:[%s118_s11] sm:$0x3] %v285_v15 }
  0x76   : > { %355 = shalt.err (!%p352_p7)
}
  0x77   : > { %235 = dma.vmem_to_hbm [thread:$0]  (%p456_p5), %s158_s12, 32, %s160_s17, %s145_s19  }
  0x78 PF: > { %p247_p8 = scmp.ge.s32.totalorder %s396_s16, 2  ;;  %s171_s29 = sand.u32 1, %s384_s13  }
  0x79   : > { %s172_s30 = scalar_lea.sflag [#allocation6], %s171_s29 }
  0x7a   : > { %p242_p9 = pnand %p247_p8, %p460_p6 }
  0x7c   : > { %p243_p10 = pneg %p242_p9 }
  0x7e   : > { %379 = dma.done.wait (%p243_p10), %s172_s30, 32  }
  0x7f   : > { %381 = vsyncadd (%p243_p10), %s172_s30, 4294967264  ;;  %p21_p11 = scmp.ge.s32.totalorder %s443_s18, 6   ;;  %s508_s13 = smov %s388_s14 }
  0x80   : > { %s509_s14 = smov %s392_s15  ;;  %s510_s15 = smov %s454_s21 }
  0x81   : > { %s511_s16 = smov %s443_s18  ;;  %23 = sbr.rel (!%p21_p11) target bundleno = 10 (0xa), region = 61 }
  0x86   :  { %178 = vsyncpa [#allocation5], 1 }
  0x87   :  { %180 = vsyncpa [#allocation5 + $0x1], 1 }
  0x88   :  { %181 = vsyncpa [#allocation6], 1 }
  0x89   :  { %183 = vsyncpa [#allocation6 + $0x1], 1 }

</bundles_post_ra>
